<compile_context>
chip_gen: v5e
topology: v5e:2x2
jax: 0.10.0
libtpu: 0.0.40
codegen_flags: <defaults>
</compile_context>

<pallas_src>
import jax
import jax.numpy as jnp
import numpy as np
from jax import lax
from jax.experimental import pallas as pl
from jax.experimental.pallas import tpu as pltpu

# ---- small, forward-consistent hyperparameters (scaled-down Args) ----------
B = 2              # batch
T = 8              # sequence (batch_length)
STOCH = 128        # stochastic_size      (orig: 32*32 = 1024)
DET = 128          # deterministic_size   (orig: 512)
D_IN = STOCH + DET
HIDDEN = 256       # orig: 512
ACT_DIM = 6        # walker-walk action dim
OUT = 2 * ACT_DIM  # mean + std logits
OUT_PAD = 128      # lane-dense padded output head
LN_EPS = 1e-3
STD_MIN, STD_MAX = 0.1, 1.0
MAX_TM = 512       # row tile cap (multiple of 128: clean on v5e's 128-row MXU)


def _round_up(x, m):
    return (x + m - 1) // m * m


# ---------------------------- Pallas kernel ---------------------------------
def actor_kernel(xp_ref, xd_ref, w1_ref, ln_ref, w2_ref, w3_ref, b3_ref, o_ref):
    # --- block 1: in-kernel lane-adjacent concat + single K=256 bf16 dot ---
    x = jnp.concatenate([xp_ref[...].astype(jnp.bfloat16),
                         xd_ref[...].astype(jnp.bfloat16)], axis=-1)
    h = jnp.dot(x, w1_ref[...], preferred_element_type=jnp.float32)

    def ln_silu(h, g, b):
        # two-pass (centered) LayerNorm, matching nn.LayerNorm / the reference
        mu = jnp.mean(h, axis=-1, keepdims=True)
        c = h - mu
        var = jnp.mean(c * c, axis=-1, keepdims=True)
        h = c * lax.rsqrt(var + LN_EPS) * g + b
        return h * jax.nn.sigmoid(h)            # SiLU

    h = ln_silu(h, ln_ref[0:1, :], ln_ref[1:2, :])

    # --- block 2: Linear(no bias) -> LayerNorm -> SiLU ---
    h = jnp.dot(h.astype(jnp.bfloat16), w2_ref[...],
                preferred_element_type=jnp.float32)
    h = ln_silu(h, ln_ref[2:3, :], ln_ref[3:4, :])

    # --- output head: Linear(H, OUT_PAD); bias already carries the +2.0
    #     std-logit shift on the std columns (cols >= OUT are padding) ---
    out = jnp.dot(h.astype(jnp.bfloat16), w3_ref[...],
                  preferred_element_type=jnp.float32)
    out = out + b3_ref[...]

    # single-sigmoid epilogue: tanh(x) = 2*sigmoid(2x) - 1
    col = lax.broadcasted_iota(jnp.int32, out.shape, 1)
    is_mean = col < ACT_DIM
    z = jnp.where(is_mean, 2.0 * out, out)
    s = jax.nn.sigmoid(z)
    res = jnp.where(is_mean, 2.0 * s - 1.0,
                    STD_MIN + (STD_MAX - STD_MIN) * s)
    o_ref[...] = res.astype(o_ref.dtype)


def actor_forward(posterior, deterministic, kparams):
    """posterior: (..., STOCH); deterministic: (..., DET)
    -> (mean, std), each of shape (..., ACT_DIM)."""
    lead = posterior.shape[:-1]
    n = int(np.prod(lead))

    # f32 straight into pallas_call; bf16 cast happens in-kernel.
    xp = posterior.reshape(n, STOCH)
    xd = deterministic.reshape(n, DET)

    (w1, ln, w2, w3p, b3p) = kparams

    # Row tile: whole problem in one grid step when small; cap at MAX_TM so the
    # MXU row dimension stays full once N grows. Rows padded -> cdiv-safe grid.
    tm = min(_round_up(max(n, 1), 8), MAX_TM)
    n_pad = _round_up(n, tm)
    if n_pad != n:
        xp = jnp.pad(xp, ((0, n_pad - n), (0, 0)))
        xd = jnp.pad(xd, ((0, n_pad - n), (0, 0)))

    steps = n_pad // tm
    grid = (steps,)

    # Grid-invariant weight/LN blocks; single-buffer them when the grid has
    # multiple steps (they are never re-fetched).
    if steps > 1:
        inv = lambda shape: pl.BlockSpec(shape, lambda i: (0, 0),
                                         pipeline_mode=pl.Buffered(1))
    else:
        inv = lambda shape: pl.BlockSpec(shape, lambda i: (0, 0))

    out_flat = pl.pallas_call(
        actor_kernel,
        out_shape=jax.ShapeDtypeStruct((n_pad, OUT_PAD), jnp.float32),
        grid_spec=pltpu.PrefetchScalarGridSpec(
            num_scalar_prefetch=0,
            grid=grid,
            in_specs=[
                pl.BlockSpec((tm, STOCH), lambda i: (i, 0)),   # posterior rows
                pl.BlockSpec((tm, DET), lambda i: (i, 0)),     # deterministic rows
                inv((D_IN, HIDDEN)),                           # w1 (bf16, unsplit)
                inv((8, HIDDEN)),                              # packed LN params
                inv((HIDDEN, HIDDEN)),                         # w2 (bf16)
                inv((HIDDEN, OUT_PAD)),                        # w3 (bf16, padded)
                inv((1, OUT_PAD)),                             # b3 (+2 folded, padded)
            ],
            out_specs=pl.BlockSpec((tm, OUT_PAD), lambda i: (i, 0)),
        ),
        compiler_params=pltpu.CompilerParams(
            dimension_semantics=("parallel",)),
    )(xp, xd, w1, ln, w2, w3p, b3p)

    out = out_flat[:n, :OUT]
    mean = out[:, :ACT_DIM].reshape(*lead, ACT_DIM)
    std = out[:, ACT_DIM:].reshape(*lead, ACT_DIM)
    # TODO(synk): torch.distributions.Independent(Normal(mean, std), 1) has no
    # Pallas equivalent; the kernel returns the distribution parameters.
    return mean, std


# ---------------------- deterministic parameter init ------------------------
def trunc_normal_linear(key, fan_in, fan_out):
    # mirrors init_weights for nn.Linear(bias=False)
    denoms = (fan_in + fan_out) / 2.0
    std = np.sqrt(1.0 / denoms) / 0.8796256610342398
    return std * jax.random.truncated_normal(key, -2.0, 2.0,
                                             (fan_in, fan_out), jnp.float32)


def uniform_linear(key, fan_in, fan_out, given_scale=1.0):
    # mirrors uniform_init_weights(1.0) for the last Linear; bias is zeroed
    denoms = (fan_in + fan_out) / 2.0
    limit = float(np.sqrt(3.0 * given_scale / denoms))
    return jax.random.uniform(key, (fan_in, fan_out), jnp.float32,
                              minval=-limit, maxval=limit)


def make_params(key):
    k1, k2, k3 = jax.random.split(key, 3)
    w1 = trunc_normal_linear(k1, D_IN, HIDDEN)
    g1 = jnp.ones((HIDDEN,), jnp.float32)
    b1 = jnp.zeros((HIDDEN,), jnp.float32)
    w2 = trunc_normal_linear(k2, HIDDEN, HIDDEN)
    g2 = jnp.ones((HIDDEN,), jnp.float32)
    b2 = jnp.zeros((HIDDEN,), jnp.float32)
    w3 = uniform_linear(k3, HIDDEN, OUT, 1.0)
    b3 = jnp.zeros((OUT,), jnp.float32)
    return (w1, g1, b1, w2, g2, b2, w3, b3)


def pack_params(params):
    """Kernel layout: bf16 weights, the four LN vectors packed into one
    (8, HIDDEN) f32 block (rows 0..3 = g1,b1,g2,b2), output head padded to
    OUT_PAD lanes with the +2.0 std-logit shift folded into the bias."""
    w1, g1, b1, w2, g2, b2, w3, b3 = params
    ln = jnp.zeros((8, HIDDEN), jnp.float32)
    ln = ln.at[0].set(g1).at[1].set(b1).at[2].set(g2).at[3].set(b2)

    w3p = jnp.zeros((HIDDEN, OUT_PAD), jnp.float32).at[:, :OUT].set(w3)
    b3p = jnp.zeros((1, OUT_PAD), jnp.float32).at[0, :OUT].set(b3)
    b3p = b3p.at[0, ACT_DIM:OUT].add(2.0)          # fold the +2.0 std shift

    return (w1.astype(jnp.bfloat16), ln, w2.astype(jnp.bfloat16),
            w3p.astype(jnp.bfloat16), b3p)


# ----------------------------- pure-JAX reference ----------------------------
def reference_forward(posterior, deterministic, params):
    # Mirrors the module forward; matmul inputs are cast to bf16 exactly like
    # the kernel so the comparison tolerance can stay tight.
    w1, g1, b1, w2, g2, b2, w3, b3 = params
    lead = posterior.shape[:-1]
    n = int(np.prod(lead))
    x = jnp.concatenate([posterior.reshape(n, STOCH),
                         deterministic.reshape(n, DET)],
                        axis=1).astype(jnp.bfloat16)

    def ln(h, g, bb):
        mu = h.mean(-1, keepdims=True)
        c = h - mu
        var = (c * c).mean(-1, keepdims=True)
        return c * lax.rsqrt(var + LN_EPS) * g + bb

    h = jnp.dot(x, w1.astype(jnp.bfloat16), preferred_element_type=jnp.float32)
    h = ln(h, g1, b1)
    h = h * jax.nn.sigmoid(h)
    h = jnp.dot(h.astype(jnp.bfloat16), w2.astype(jnp.bfloat16),
                preferred_element_type=jnp.float32)
    h = ln(h, g2, b2)
    h = h * jax.nn.sigmoid(h)
    out = jnp.dot(h.astype(jnp.bfloat16), w3.astype(jnp.bfloat16),
                  preferred_element_type=jnp.float32) + b3

    mean = jnp.tanh(out[:, :ACT_DIM])
    std = STD_MIN + (STD_MAX - STD_MIN) * jax.nn.sigmoid(out[:, ACT_DIM:] + 2.0)
    return mean.reshape(*lead, ACT_DIM), std.reshape(*lead, ACT_DIM)


if __name__ == "__main__":
    key = jax.random.PRNGKey(0)
    kp, kd, kw = jax.random.split(key, 3)
    posterior = jax.random.normal(kp, (B, T, STOCH), dtype=jnp.float32)
    deterministic = jax.random.normal(kd, (B, T, DET), dtype=jnp.float32)

    params = make_params(kw)
    kparams = pack_params(params)

    mean, std = actor_forward(posterior, deterministic, kparams)
    mean, std = jax.block_until_ready((mean, std))

    ref_mean, ref_std = reference_forward(posterior, deterministic, params)

    assert mean.shape == (B, T, ACT_DIM), mean.shape
    assert std.shape == (B, T, ACT_DIM), std.shape
    # Tolerance absorbs bf16-rounding / accumulation-order / tanh-via-sigmoid
    # differences between the kernel and the matched reference.
    np.testing.assert_allclose(np.asarray(mean), np.asarray(ref_mean),
                               rtol=2e-3, atol=2e-3)
    np.testing.assert_allclose(np.asarray(std), np.asarray(ref_std),
                               rtol=2e-3, atol=2e-3)
    # distribution-parameter sanity: tanh-squashed mean, std in [0.1, 1.0]
    assert bool(jnp.all(jnp.abs(mean) <= 1.0))
    assert bool(jnp.all(std >= STD_MIN)) and bool(jnp.all(std <= STD_MAX))
    print("KERNEL_OK")
</pallas_src>

<mosaic_0001>
module attributes {stable_mosaic.version = 11 : i64} {
  func.func @actor_kernel(%arg0: i32, %arg1: memref<16x128xf32, #tpu.memory_space<vmem>>, %arg2: memref<16x128xf32, #tpu.memory_space<vmem>>, %arg3: memref<256x256xbf16, #tpu.memory_space<vmem>>, %arg4: memref<8x256xf32, #tpu.memory_space<vmem>>, %arg5: memref<256x256xbf16, #tpu.memory_space<vmem>>, %arg6: memref<256x128xbf16, #tpu.memory_space<vmem>>, %arg7: memref<1x128xf32, #tpu.memory_space<vmem>>, %arg8: memref<16x128xf32, #tpu.memory_space<vmem>>) attributes {dimension_semantics = [#tpu.dimension_semantics<parallel>], iteration_bounds = array<i64: 1>, scalar_prefetch = 0 : i64, scratch_operands = 0 : i64, tpu.core_type = #tpu.core_type<tc>, window_params = [{transform_indices = @transform_0, window_bounds = array<i64: 16, 128>}, {transform_indices = @transform_1, window_bounds = array<i64: 16, 128>}, {pipeline_mode = #tpu.pipeline_mode<synchronous>, transform_indices = @transform_2, window_bounds = array<i64: 256, 256>}, {pipeline_mode = #tpu.pipeline_mode<synchronous>, transform_indices = @transform_3, window_bounds = array<i64: 8, 256>}, {pipeline_mode = #tpu.pipeline_mode<synchronous>, transform_indices = @transform_4, window_bounds = array<i64: 256, 256>}, {pipeline_mode = #tpu.pipeline_mode<synchronous>, transform_indices = @transform_5, window_bounds = array<i64: 256, 128>}, {pipeline_mode = #tpu.pipeline_mode<synchronous>, transform_indices = @transform_6, window_bounds = array<i64: 1, 128>}, {transform_indices = @transform_7, window_bounds = array<i64: 16, 128>}]} {
    %c0 = arith.constant 0 : index
    %c0_0 = arith.constant 0 : index
    %0 = vector.load %arg1[%c0, %c0_0] : memref<16x128xf32, #tpu.memory_space<vmem>>, vector<16x128xf32>
    %1 = arith.truncf %0 : vector<16x128xf32> to vector<16x128xbf16>
    %c0_1 = arith.constant 0 : index
    %c0_2 = arith.constant 0 : index
    %2 = vector.load %arg2[%c0_1, %c0_2] : memref<16x128xf32, #tpu.memory_space<vmem>>, vector<16x128xf32>
    %3 = arith.truncf %2 : vector<16x128xf32> to vector<16x128xbf16>
    %4 = tpu.concatenate %1, %3 in 1 : vector<16x128xbf16>, vector<16x128xbf16> -> vector<16x256xbf16>
    %c0_3 = arith.constant 0 : index
    %c0_4 = arith.constant 0 : index
    %5 = vector.load %arg3[%c0_3, %c0_4] : memref<256x256xbf16, #tpu.memory_space<vmem>>, vector<256x256xbf16>
    %cst = arith.constant dense<0.000000e+00> : vector<16x256xf32>
    %6 = tpu.matmul %4, %5, %cst {dimension_numbers = #tpu.dot_dimension_numbers<[1], [0], [0], [1], [0, 0, 1, 1], [], []>} : vector<16x256xbf16>, vector<256x256xbf16>, vector<16x256xf32> -> vector<16x256xf32>
    %c0_5 = arith.constant 0 : index
    %c0_6 = arith.constant 0 : index
    %7 = vector.load %arg4[%c0_5, %c0_6] : memref<8x256xf32, #tpu.memory_space<vmem>>, vector<1x256xf32>
    %c1 = arith.constant 1 : index
    %c0_7 = arith.constant 0 : index
    %8 = vector.load %arg4[%c1, %c0_7] : memref<8x256xf32, #tpu.memory_space<vmem>>, vector<1x256xf32>
    %cst_8 = arith.constant dense<0.000000e+00> : vector<16xf32>
    %9 = vector.multi_reduction <add>, %6, %cst_8 [1] : vector<16x256xf32> to vector<16xf32>
    %10 = vector.shape_cast %9 : vector<16xf32> to vector<16x1xf32>
    %cst_9 = arith.constant 2.560000e+02 : f32
    %11 = vector.broadcast %cst_9 : f32 to vector<16x1xf32>
    %12 = arith.divf %10, %11 : vector<16x1xf32>
    %13 = vector.broadcast %12 : vector<16x1xf32> to vector<16x256xf32>
    %14 = arith.subf %6, %13 : vector<16x256xf32>
    %15 = arith.mulf %14, %14 : vector<16x256xf32>
    %cst_10 = arith.constant dense<0.000000e+00> : vector<16xf32>
    %16 = vector.multi_reduction <add>, %15, %cst_10 [1] : vector<16x256xf32> to vector<16xf32>
    %17 = vector.shape_cast %16 : vector<16xf32> to vector<16x1xf32>
    %cst_11 = arith.constant 2.560000e+02 : f32
    %18 = vector.broadcast %cst_11 : f32 to vector<16x1xf32>
    %19 = arith.divf %17, %18 : vector<16x1xf32>
    %cst_12 = arith.constant 1.000000e-03 : f32
    %20 = vector.broadcast %cst_12 : f32 to vector<16x1xf32>
    %21 = arith.addf %19, %20 : vector<16x1xf32>
    %22 = math.rsqrt %21 : vector<16x1xf32>
    %23 = vector.broadcast %22 : vector<16x1xf32> to vector<16x256xf32>
    %24 = arith.mulf %14, %23 : vector<16x256xf32>
    %25 = vector.broadcast %7 : vector<1x256xf32> to vector<16x256xf32>
    %26 = arith.mulf %24, %25 : vector<16x256xf32>
    %27 = vector.broadcast %8 : vector<1x256xf32> to vector<16x256xf32>
    %28 = arith.addf %26, %27 : vector<16x256xf32>
    %29 = arith.negf %28 : vector<16x256xf32>
    %30 = math.exp %29 : vector<16x256xf32>
    %cst_13 = arith.constant 1.000000e+00 : f32
    %31 = vector.broadcast %cst_13 : f32 to vector<16x256xf32>
    %32 = arith.addf %31, %30 : vector<16x256xf32>
    %33 = arith.divf %31, %32 : vector<16x256xf32>
    %34 = arith.mulf %28, %33 : vector<16x256xf32>
    %35 = arith.truncf %34 : vector<16x256xf32> to vector<16x256xbf16>
    %c0_14 = arith.constant 0 : index
    %c0_15 = arith.constant 0 : index
    %36 = vector.load %arg5[%c0_14, %c0_15] : memref<256x256xbf16, #tpu.memory_space<vmem>>, vector<256x256xbf16>
    %cst_16 = arith.constant dense<0.000000e+00> : vector<16x256xf32>
    %37 = tpu.matmul %35, %36, %cst_16 {dimension_numbers = #tpu.dot_dimension_numbers<[1], [0], [0], [1], [0, 0, 1, 1], [], []>} : vector<16x256xbf16>, vector<256x256xbf16>, vector<16x256xf32> -> vector<16x256xf32>
    %c2 = arith.constant 2 : index
    %c0_17 = arith.constant 0 : index
    %38 = vector.load %arg4[%c2, %c0_17] : memref<8x256xf32, #tpu.memory_space<vmem>>, vector<1x256xf32>
    %c3 = arith.constant 3 : index
    %c0_18 = arith.constant 0 : index
    %39 = vector.load %arg4[%c3, %c0_18] : memref<8x256xf32, #tpu.memory_space<vmem>>, vector<1x256xf32>
    %cst_19 = arith.constant dense<0.000000e+00> : vector<16xf32>
    %40 = vector.multi_reduction <add>, %37, %cst_19 [1] : vector<16x256xf32> to vector<16xf32>
    %41 = vector.shape_cast %40 : vector<16xf32> to vector<16x1xf32>
    %cst_20 = arith.constant 2.560000e+02 : f32
    %42 = vector.broadcast %cst_20 : f32 to vector<16x1xf32>
    %43 = arith.divf %41, %42 : vector<16x1xf32>
    %44 = vector.broadcast %43 : vector<16x1xf32> to vector<16x256xf32>
    %45 = arith.subf %37, %44 : vector<16x256xf32>
    %46 = arith.mulf %45, %45 : vector<16x256xf32>
    %cst_21 = arith.constant dense<0.000000e+00> : vector<16xf32>
    %47 = vector.multi_reduction <add>, %46, %cst_21 [1] : vector<16x256xf32> to vector<16xf32>
    %48 = vector.shape_cast %47 : vector<16xf32> to vector<16x1xf32>
    %cst_22 = arith.constant 2.560000e+02 : f32
    %49 = vector.broadcast %cst_22 : f32 to vector<16x1xf32>
    %50 = arith.divf %48, %49 : vector<16x1xf32>
    %cst_23 = arith.constant 1.000000e-03 : f32
    %51 = vector.broadcast %cst_23 : f32 to vector<16x1xf32>
    %52 = arith.addf %50, %51 : vector<16x1xf32>
    %53 = math.rsqrt %52 : vector<16x1xf32>
    %54 = vector.broadcast %53 : vector<16x1xf32> to vector<16x256xf32>
    %55 = arith.mulf %45, %54 : vector<16x256xf32>
    %56 = vector.broadcast %38 : vector<1x256xf32> to vector<16x256xf32>
    %57 = arith.mulf %55, %56 : vector<16x256xf32>
    %58 = vector.broadcast %39 : vector<1x256xf32> to vector<16x256xf32>
    %59 = arith.addf %57, %58 : vector<16x256xf32>
    %60 = arith.negf %59 : vector<16x256xf32>
    %61 = math.exp %60 : vector<16x256xf32>
    %cst_24 = arith.constant 1.000000e+00 : f32
    %62 = vector.broadcast %cst_24 : f32 to vector<16x256xf32>
    %63 = arith.addf %62, %61 : vector<16x256xf32>
    %64 = arith.divf %62, %63 : vector<16x256xf32>
    %65 = arith.mulf %59, %64 : vector<16x256xf32>
    %66 = arith.truncf %65 : vector<16x256xf32> to vector<16x256xbf16>
    %c0_25 = arith.constant 0 : index
    %c0_26 = arith.constant 0 : index
    %67 = vector.load %arg6[%c0_25, %c0_26] : memref<256x128xbf16, #tpu.memory_space<vmem>>, vector<256x128xbf16>
    %cst_27 = arith.constant dense<0.000000e+00> : vector<16x128xf32>
    %68 = tpu.matmul %66, %67, %cst_27 {dimension_numbers = #tpu.dot_dimension_numbers<[1], [0], [0], [1], [0, 0, 1, 1], [], []>} : vector<16x256xbf16>, vector<256x128xbf16>, vector<16x128xf32> -> vector<16x128xf32>
    %c0_28 = arith.constant 0 : index
    %c0_29 = arith.constant 0 : index
    %69 = vector.load %arg7[%c0_28, %c0_29] : memref<1x128xf32, #tpu.memory_space<vmem>>, vector<1x128xf32>
    %70 = vector.broadcast %69 : vector<1x128xf32> to vector<16x128xf32>
    %71 = arith.addf %68, %70 : vector<16x128xf32>
    %72 = tpu.iota {dimensions = array<i32: 1>} : vector<16x128xi32>
    %c6_i32 = arith.constant 6 : i32
    %73 = vector.broadcast %c6_i32 : i32 to vector<16x128xi32>
    %74 = arith.cmpi slt, %72, %73 : vector<16x128xi32>
    %cst_30 = arith.constant 2.000000e+00 : f32
    %75 = vector.broadcast %cst_30 : f32 to vector<16x128xf32>
    %76 = arith.mulf %75, %71 : vector<16x128xf32>
    %77 = arith.select %74, %76, %71 : vector<16x128xi1>, vector<16x128xf32>
    %78 = arith.negf %77 : vector<16x128xf32>
    %79 = math.exp %78 : vector<16x128xf32>
    %cst_31 = arith.constant 1.000000e+00 : f32
    %80 = vector.broadcast %cst_31 : f32 to vector<16x128xf32>
    %81 = arith.addf %80, %79 : vector<16x128xf32>
    %82 = arith.divf %80, %81 : vector<16x128xf32>
    %cst_32 = arith.constant 2.000000e+00 : f32
    %83 = vector.broadcast %cst_32 : f32 to vector<16x128xf32>
    %84 = arith.mulf %83, %82 : vector<16x128xf32>
    %cst_33 = arith.constant 1.000000e+00 : f32
    %85 = vector.broadcast %cst_33 : f32 to vector<16x128xf32>
    %86 = arith.subf %84, %85 : vector<16x128xf32>
    %cst_34 = arith.constant 0.899999976 : f32
    %87 = vector.broadcast %cst_34 : f32 to vector<16x128xf32>
    %88 = arith.mulf %87, %82 : vector<16x128xf32>
    %cst_35 = arith.constant 1.000000e-01 : f32
    %89 = vector.broadcast %cst_35 : f32 to vector<16x128xf32>
    %90 = arith.addf %89, %88 : vector<16x128xf32>
    %91 = arith.select %74, %86, %90 : vector<16x128xi1>, vector<16x128xf32>
    %c0_36 = arith.constant 0 : index
    %c0_37 = arith.constant 0 : index
    %92 = vector.load %arg8[%c0_36, %c0_37] : memref<16x128xf32, #tpu.memory_space<vmem>>, vector<16x128xf32>
    tpu.vector_store %arg8[%c0_36, %c0_37], %91 {strides = array<i32>} : memref<16x128xf32, #tpu.memory_space<vmem>>, vector<16x128xf32>,
    return
  }
  func.func @transform_0(%arg0: i32) -> (i32, i32) {
    %c0_i32 = arith.constant 0 : i32
    %c0_i32_0 = arith.constant 0 : i32
    return %arg0, %c0_i32 : i32, i32
  }
  func.func @transform_1(%arg0: i32) -> (i32, i32) {
    %c0_i32 = arith.constant 0 : i32
    %c0_i32_0 = arith.constant 0 : i32
    return %arg0, %c0_i32 : i32, i32
  }
  func.func @transform_2(%arg0: i32) -> (i32, i32) {
    %c0_i32 = arith.constant 0 : i32
    %c0_i32_0 = arith.constant 0 : i32
    %c0_i32_1 = arith.constant 0 : i32
    return %c0_i32, %c0_i32_0 : i32, i32
  }
  func.func @transform_3(%arg0: i32) -> (i32, i32) {
    %c0_i32 = arith.constant 0 : i32
    %c0_i32_0 = arith.constant 0 : i32
    %c0_i32_1 = arith.constant 0 : i32
    return %c0_i32, %c0_i32_0 : i32, i32
  }
  func.func @transform_4(%arg0: i32) -> (i32, i32) {
    %c0_i32 = arith.constant 0 : i32
    %c0_i32_0 = arith.constant 0 : i32
    %c0_i32_1 = arith.constant 0 : i32
    return %c0_i32, %c0_i32_0 : i32, i32
  }
  func.func @transform_5(%arg0: i32) -> (i32, i32) {
    %c0_i32 = arith.constant 0 : i32
    %c0_i32_0 = arith.constant 0 : i32
    %c0_i32_1 = arith.constant 0 : i32
    return %c0_i32, %c0_i32_0 : i32, i32
  }
  func.func @transform_6(%arg0: i32) -> (i32, i32) {
    %c0_i32 = arith.constant 0 : i32
    %c0_i32_0 = arith.constant 0 : i32
    %c0_i32_1 = arith.constant 0 : i32
    return %c0_i32, %c0_i32_0 : i32, i32
  }
  func.func @transform_7(%arg0: i32) -> (i32, i32) {
    %c0_i32 = arith.constant 0 : i32
    %c0_i32_0 = arith.constant 0 : i32
    return %arg0, %c0_i32 : i32, i32
  }
}

</mosaic_0001>

<bundles_post_ra>
// kernel: tpu_custom_call.1
= control target key start
LH: loop header
LB: loop body
LE: loop exit
PB: predicated region body
PF: predicated region fallthrough
CT: control target
= control target key end

     0   :  { %12 = vsyncpa [#allocation3], 0  ;;  %s2076_s0 = inlined_call_operand.hbm [shape: f32[16,128], index: 0, kind: input, shape index: {}]   ;;  %s2077_s1 = inlined_call_operand.hbm [shape: f32[16,128], index: 1, kind: input, shape index: {}]   ;;  %s2078_s2 = inlined_call_operand.hbm [shape: bf16[256,256], index: 2, kind: input, shape index: {}]   ;;  %s2079_s3 = inlined_call_operand.hbm [shape: f32[8,256], index: 3, kind: input, shape index: {}]   ;;  %s2080_s4 = inlined_call_operand.hbm [shape: bf16[256,256], index: 4, kind: input, shape index: {}]   ;;  %s2081_s5 = inlined_call_operand.hbm [shape: bf16[256,128], index: 5, kind: input, shape index: {}]   ;;  %s2082_s6 = inlined_call_operand.vmem [shape: f32[1,128], index: 6, kind: input, shape index: {}]   ;;  %s2083_s7 = inlined_call_operand.hbm [shape: f32[16,128], index: 7, kind: output, shape index: {}]  }
   0x1   :  { %13 = vsyncpa [#allocation6], 0 }
   0x2   :  { %14 = vsyncpa [#allocation9], 0 }
   0x3   :  { %15 = vsyncpa [#allocation12], 0 }
   0x4   :  { %16 = vsyncpa [#allocation4], 0  ;;  %s34_s26 = sshll.u32 %s2077_s1, 4  ;;  %s1841_s27 = smov [#allocation5]   ;;  %s35_s26 = int_to_ptr.hbm [resolvable:$true] %s34_s26 }
   0x5   :  { %s36_s28 = sshll.u32 %s1841_s27, 4  ;;  %s61_s8 = sshll.u32 %s2079_s3, 4  ;;  %s37_s28 = int_to_ptr.vmem [resolvable:$true] %s36_s28  ;;  %s62_s8 = int_to_ptr.hbm [resolvable:$true] %s61_s8 }
   0x6   :  { %s1842_s9 = smov 128   ;;  %s1843_s10 = smov 8  }
   0x7   :  { %42 = dma.hbm_to_vmem [thread:$0]  %s35_s26, 256, %s37_s28, [#allocation6], %s1842_s9, %s1842_s9, %s1843_s10  }
   0x8   :  { %s1844_s11 = smov [#allocation8]   ;;  %s21_s1 = sshll.u32 %s2076_s0, 4  ;;  %s22_s1 = int_to_ptr.hbm [resolvable:$true] %s21_s1 }
   0x9   :  { %s63_s12 = sshll.u32 %s1844_s11, 4  ;;  %s47_s3 = sshll.u32 %s2078_s2, 4  ;;  %s64_s12 = int_to_ptr.vmem [resolvable:$true] %s63_s12  ;;  %s48_s3 = int_to_ptr.hbm [resolvable:$true] %s47_s3 }
   0xa   :  { %66 = dma.hbm_to_vmem [thread:$0]  %s62_s8, 256, %s64_s12, [#allocation9]  }
   0xb   :  { %s1845_s17 = smov [#allocation2]   ;;  %s1846_s19 = smov [#allocation7]  }
   0xc   :  { %s23_s18 = sshll.u32 %s1845_s17, 4  ;;  %s49_s20 = sshll.u32 %s1846_s19, 4  ;;  %s24_s18 = int_to_ptr.vmem [resolvable:$true] %s23_s18  ;;  %s50_s20 = int_to_ptr.vmem [resolvable:$true] %s49_s20 }
   0xd   :  { %29 = dma.hbm_to_vmem [thread:$0]  %s22_s1, 256, %s24_s18, [#allocation3], %s1842_s9, %s1842_s9, %s1843_s10  }
   0xe   :  { %s71_s0 = sshll.u32 %s2080_s4, 4  ;;  %s84_s24 = sshll.u32 %s2081_s5, 4  ;;  %s72_s0 = int_to_ptr.hbm [resolvable:$true] %s71_s0  ;;  %s85_s24 = int_to_ptr.hbm [resolvable:$true] %s84_s24 }
   0xf   :  { %55 = dma.hbm_to_vmem [thread:$0]  %s48_s3, 4096, %s50_s20, [#allocation6], %s1842_s9, %s1842_s9, %s1843_s10  }
  0x10   :  { %s1847_s25 = smov [#allocation10]   ;;  %s1848_s27 = smov [#allocation11]  }
  0x11   :  { %s73_s26 = sshll.u32 %s1847_s25, 4  ;;  %s86_s4 = sshll.u32 %s1848_s27, 4  ;;  %s74_s26 = int_to_ptr.vmem [resolvable:$true] %s73_s26  ;;  %s87_s4 = int_to_ptr.vmem [resolvable:$true] %s86_s4 }
  0x12   :  { %79 = dma.hbm_to_vmem [thread:$0]  %s72_s0, 4096, %s74_s26, [#allocation9], %s1842_s9, %s1842_s9, %s1843_s10  }
  0x13   :  { %s1849_s28 = smov 64   ;;  %s1850_s29 = smov 4  }
  0x14   :  { %92 = dma.hbm_to_vmem [thread:$0]  %s85_s24, 2048, %s87_s4, [#allocation12], %s1849_s28, %s1849_s28, %s1850_s29  }
  0x15   :  { %1831 = dma.done.wait [#allocation3], 256  }
  0x16   :  { %1832 = vsyncadd [#allocation3], 4294967040 }
  0x17   :  { %1833 = dma.done.wait [#allocation6], 4352  }
  0x18   :  { %1834 = vsyncadd [#allocation6], 4294962944 }
  0x19   :  { %1835 = dma.done.wait [#allocation9], 4352  }
  0x1a   :  { %1836 = vsyncadd [#allocation9], 4294962944 }
  0x1b   :  { %1837 = dma.done.wait [#allocation12], 2048  }
  0x1c   :  { %1838 = vsyncadd [#allocation12], 4294965248  ;;  %v1246_v0 = vld [vmem:[#allocation7 + $0x70] sm:$0xf]  ;;  %v1535_v1 = vld [vmem:[#allocation7 + $0x74] sm:$0xf0] }
  0x1d   :  { %v1310_v2 = vld [vmem:[#allocation7 + $0xf0] sm:$0xf]  ;;  %v1247_v3 = vor.u32 %v1535_v1, %v1246_v0  ;;  %v1551_v4 = vld [vmem:[#allocation7 + $0xf4] sm:$0xf0]  ;;  %v1534_v5 = vld [vmem:[#allocation7 + $0x74] sm:$0xf] }
  0x1e   :  { %v1248_v6 = vld [vmem:[#allocation7 + $0x78] sm:$0xf0]  ;;  %v1311_v7 = vor.u32 %v1551_v4, %v1310_v2  ;;  %v1550_v9 = vld [vmem:[#allocation7 + $0xf4] sm:$0xf]  ;;  %v1238_v11 = vld [vmem:[#allocation7 + $0x60] sm:$0xf] }
  0x1f   :  { %v1251_v8 = vor.u32 %v1534_v5, %v1248_v6  ;;  %v1312_v10 = vld [vmem:[#allocation7 + $0xf8] sm:$0xf0]  ;;  %331 = vmatpush.bf16.msra.mxu0 %v1247_v3  ;;  %v1533_v13 = vld [vmem:[#allocation7 + $0x64] sm:$0xf0]  ;;  %v1302_v14 = vld [vmem:[#allocation7 + $0xe0] sm:$0xf] }
  0x20   :  { %v1315_v12 = vor.u32 %v1550_v9, %v1312_v10  ;;  %v1549_v15 = vld [vmem:[#allocation7 + $0xe4] sm:$0xf0]  ;;  %345 = vmatpush.bf16.msra.mxu1 %v1311_v7  ;;  %v1239_v16 = vor.u32 %v1533_v13, %v1238_v11  ;;  %v1532_v18 = vld [vmem:[#allocation7 + $0x64] sm:$0xf]  ;;  %v1240_v19 = vld [vmem:[#allocation7 + $0x68] sm:$0xf0] }
  0x21   :  { %359 = vmatpush.bf16.msra.mxu2 %v1251_v8  ;;  %v1303_v17 = vor.u32 %v1549_v15, %v1302_v14  ;;  %v1548_v20 = vld [vmem:[#allocation7 + $0xe4] sm:$0xf]  ;;  %v1243_v21 = vor.u32 %v1532_v18, %v1240_v19  ;;  %v1304_v22 = vld [vmem:[#allocation7 + $0xe8] sm:$0xf0]  ;;  %v1230_v23 = vld [vmem:[#allocation7 + $0x50] sm:$0xf] }
  0x22   :  { %373 = vmatpush.bf16.msra.mxu3 %v1315_v12  ;;  %v1531_v24 = vld [vmem:[#allocation7 + $0x54] sm:$0xf0]  ;;  %v1307_v25 = vor.u32 %v1548_v20, %v1304_v22  ;;  %v1294_v26 = vld [vmem:[#allocation7 + $0xd0] sm:$0xf]  ;;  %v1530_v28 = vld [vmem:[#allocation7 + $0x54] sm:$0xf] }
  0x23   :  { %v1547_v27 = vld [vmem:[#allocation7 + $0xd4] sm:$0xf0]  ;;  %332 = vmatpush.bf16.msra.mxu0 %v1239_v16  ;;  %v1231_v29 = vor.u32 %v1531_v24, %v1230_v23  ;;  %v1232_v30 = vld [vmem:[#allocation7 + $0x58] sm:$0xf0]  ;;  %v1546_v31 = vld [vmem:[#allocation7 + $0xd4] sm:$0xf] }
  0x24   :  { %v1296_v32 = vld [vmem:[#allocation7 + $0xd8] sm:$0xf0]  ;;  %346 = vmatpush.bf16.msra.mxu1 %v1303_v17  ;;  %v1295_v33 = vor.u32 %v1547_v27, %v1294_v26  ;;  %v1235_v34 = vor.u32 %v1530_v28, %v1232_v30  ;;  %v1222_v35 = vld [vmem:[#allocation7 + $0x40] sm:$0xf]  ;;  %v1529_v36 = vld [vmem:[#allocation7 + $0x44] sm:$0xf0] }
  0x25   :  { %360 = vmatpush.bf16.msra.mxu2 %v1243_v21  ;;  %v1286_v37 = vld [vmem:[#allocation7 + $0xc0] sm:$0xf]  ;;  %v1299_v38 = vor.u32 %v1546_v31, %v1296_v32  ;;  %v1545_v39 = vld [vmem:[#allocation7 + $0xc4] sm:$0xf0]  ;;  %v1528_v40 = vld [vmem:[#allocation7 + $0x44] sm:$0xf]  ;;  %v1223_v44 = vor.u32 %v1529_v36, %v1222_v35 }
  0x26   :  { %374 = vmatpush.bf16.msra.mxu3 %v1307_v25  ;;  %v1224_v41 = vld [vmem:[#allocation7 + $0x48] sm:$0xf0]  ;;  %v1544_v42 = vld [vmem:[#allocation7 + $0xc4] sm:$0xf]  ;;  %v1287_v45 = vor.u32 %v1545_v39, %v1286_v37  ;;  %v1214_v47 = vld [vmem:[#allocation7 + $0x30] sm:$0xf] }
  0x27   :  { %v1288_v43 = vld [vmem:[#allocation7 + $0xc8] sm:$0xf0]  ;;  %333 = vmatpush.bf16.msra.mxu0 %v1231_v29  ;;  %v1227_v46 = vor.u32 %v1528_v40, %v1224_v41  ;;  %v1527_v48 = vld [vmem:[#allocation7 + $0x34] sm:$0xf0]  ;;  %v1278_v49 = vld [vmem:[#allocation7 + $0xb0] sm:$0xf] }
  0x28   :  { %347 = vmatpush.bf16.msra.mxu1 %v1295_v33  ;;  %v1291_v50 = vor.u32 %v1544_v42, %v1288_v43  ;;  %v1543_v51 = vld [vmem:[#allocation7 + $0xb4] sm:$0xf0]  ;;  %v1526_v52 = vld [vmem:[#allocation7 + $0x34] sm:$0xf]  ;;  %v1216_v53 = vld [vmem:[#allocation7 + $0x38] sm:$0xf0]  ;;  %v1215_v56 = vor.u32 %v1527_v48, %v1214_v47 }
  0x29   :  { %361 = vmatpush.bf16.msra.mxu2 %v1235_v34  ;;  %v1542_v54 = vld [vmem:[#allocation7 + $0xb4] sm:$0xf]  ;;  %v1280_v55 = vld [vmem:[#allocation7 + $0xb8] sm:$0xf0]  ;;  %v1279_v57 = vor.u32 %v1543_v51, %v1278_v49  ;;  %v1219_v58 = vor.u32 %v1526_v52, %v1216_v53  ;;  %v1206_v59 = vld [vmem:[#allocation7 + $0x20] sm:$0xf] }
  0x2a   :  { %375 = vmatpush.bf16.msra.mxu3 %v1299_v38  ;;  %v1525_v60 = vld [vmem:[#allocation7 + $0x24] sm:$0xf0]  ;;  %v1270_v61 = vld [vmem:[#allocation7 + $0xa0] sm:$0xf]  ;;  %v1283_v62 = vor.u32 %v1542_v54, %v1280_v55  ;;  %v1524_v0 = vld [vmem:[#allocation7 + $0x24] sm:$0xf] }
  0x2b   :  { %334 = vmatpush.bf16.msra.mxu0 %v1223_v44  ;;  %v1541_v63 = vld [vmem:[#allocation7 + $0xa4] sm:$0xf0]  ;;  %v1208_v1 = vld [vmem:[#allocation7 + $0x28] sm:$0xf0]  ;;  %v1540_v2 = vld [vmem:[#allocation7 + $0xa4] sm:$0xf]  ;;  %v1207_v5 = vor.u32 %v1525_v60, %v1206_v59 }
  0x2c   :  { %348 = vmatpush.bf16.msra.mxu1 %v1287_v45  ;;  %v1272_v3 = vld [vmem:[#allocation7 + $0xa8] sm:$0xf0]  ;;  %v1198_v4 = vld [vmem:[#allocation7 + $0x10] sm:$0xf]  ;;  %v1523_v6 = vld [vmem:[#allocation7 + $0x14] sm:$0xf0]  ;;  %v1271_v9 = vor.u32 %v1541_v63, %v1270_v61  ;;  %v1211_v10 = vor.u32 %v1524_v0, %v1208_v1 }
  0x2d   :  { %362 = vmatpush.bf16.msra.mxu2 %v1227_v46  ;;  %v1262_v7 = vld [vmem:[#allocation7 + $0x90] sm:$0xf]  ;;  %v1539_v8 = vld [vmem:[#allocation7 + $0x94] sm:$0xf0]  ;;  %v1522_v11 = vld [vmem:[#allocation7 + $0x14] sm:$0xf]  ;;  %v1275_v14 = vor.u32 %v1540_v2, %v1272_v3  ;;  %v1199_v22 = vor.u32 %v1523_v6, %v1198_v4 }
  0x2e   :  { %376 = vmatpush.bf16.msra.mxu3 %v1291_v50  ;;  %v1200_v12 = vld [vmem:[#allocation7 + $0x18] sm:$0xf0]  ;;  %v1538_v13 = vld [vmem:[#allocation7 + $0x94] sm:$0xf]  ;;  %v119_v16 = vld [vmem:[#allocation2] sm:$0xff]  ;;  %v1263_v25 = vor.u32 %v1539_v8, %v1262_v7  ;;  %v1851_v60 = vmov 256.0  }
  0x2f   :  { %335 = vmatpush.bf16.msra.mxu0 %v1215_v56  ;;  %v1264_v15 = vld [vmem:[#allocation7 + $0x98] sm:$0xf0]  ;;  %v120_v17 = vld [vmem:[#allocation2 + $0x8] sm:$0xff]  ;;  %v121_v18 = vpack.c.bf16 %v119_v16, %v119_v16  ;;  %v123_v20 = vld [vmem:[#allocation5] sm:$0xff]  ;;  %v1203_v26 = vor.u32 %v1522_v11, %v1200_v12  ;;  %1613 = vrcp.f32 %v1851_v60  ;;  %s1172_s13 = sshll.u32 %s2083_s7, 4  ;;  %s1173_s13 = int_to_ptr.hbm [resolvable:$true] %s1172_s13 }
  0x30   :  { %349 = vmatpush.bf16.msra.mxu1 %v1279_v57  ;;  %v122_v19 = vpack.c.bf16 %v120_v17, %v120_v17  ;;  %v124_v21 = vld [vmem:[#allocation5 + $0x8] sm:$0xff]  ;;  %v125_v23 = vpack.c.bf16 %v123_v20, %v123_v20  ;;  %v1190_v27 = vld [vmem:[#allocation7] sm:$0xf]  ;;  %v1521_v28 = vld [vmem:[#allocation7 + $0x4] sm:$0xf0]  ;;  %v1267_v30 = vor.u32 %v1538_v13, %v1264_v15 }
  0x31   :  { %363 = vmatpush.bf16.msra.mxu2 %v1219_v58  ;;  %v126_v24 = vpack.c.bf16 %v124_v21, %v124_v21  ;;  %v1254_v29 = vld [vmem:[#allocation7 + $0x80] sm:$0xf]  ;;  %v1537_v31 = vld [vmem:[#allocation7 + $0x84] sm:$0xf0]  ;;  %v1520_v32 = vld [vmem:[#allocation7 + $0x4] sm:$0xf]  ;;  %v129_v36 = vunpack.c.l.b16 %v121_v18  ;;  %v1191_v38 = vor.u32 %v1521_v28, %v1190_v27 }
  0x32   :  { %377 = vmatpush.bf16.msra.mxu3 %v1283_v62  ;;  %v1192_v33 = vld [vmem:[#allocation7 + $0x8] sm:$0xf0]  ;;  %v1536_v34 = vld [vmem:[#allocation7 + $0x84] sm:$0xf]  ;;  %v130_v37 = vunpack.c.l.b16 %v122_v19  ;;  %v135_v39 = vunpack.c.l.b16 %v125_v23  ;;  %v1255_v41 = vor.u32 %v1537_v31, %v1254_v29  ;;  %v1378_v17 = vld [vmem:[#allocation10 + $0x70] sm:$0xf] }
  0x33   :  { %336 = vmatpush.bf16.msra.mxu0 %v1207_v5  ;;  %v1256_v35 = vld [vmem:[#allocation7 + $0x88] sm:$0xf0]  ;;  %v136_v40 = vunpack.c.l.b16 %v126_v24  ;;  %v1195_v42 = vor.u32 %v1520_v32, %v1192_v33  ;;  %v1567_v18 = vld [vmem:[#allocation10 + $0x74] sm:$0xf0]  ;;  %v1442_v19 = vld [vmem:[#allocation10 + $0xf0] sm:$0xf] }
  0x34   :  { %350 = vmatpush.bf16.msra.mxu1 %v1271_v9  ;;  %v1259_v43 = vor.u32 %v1536_v34, %v1256_v35  ;;  %v131_v44 = vpack.c.b16 %v130_v37, %v129_v36  ;;  %v1379_v21 = vor.u32 %v1567_v18, %v1378_v17  ;;  %v1566_v23 = vld [vmem:[#allocation10 + $0x74] sm:$0xf]  ;;  %v1380_v24 = vld [vmem:[#allocation10 + $0x78] sm:$0xf0]  ;;  %v1565_v32 = vld [vmem:[#allocation10 + $0x64] sm:$0xf0] }
  0x35   :  { %364 = vmatpush.bf16.msra.mxu2 %v1211_v10  ;;  %v137_v45 = vpack.c.b16 %v136_v40, %v135_v39  ;;  %v1614_v61 = vpop.eup %1613  ;;  %v1383_v27 = vor.u32 %v1566_v23, %v1380_v24  ;;  %v1582_v28 = vld [vmem:[#allocation10 + $0xf4] sm:$0xf]  ;;  %v1444_v29 = vld [vmem:[#allocation10 + $0xf8] sm:$0xf0]  ;;  %v1434_v33 = vld [vmem:[#allocation10 + $0xe0] sm:$0xf] }
  0x36   :  { %378 = vmatpush.bf16.msra.mxu3 %v1275_v14  ;;  %v397_v62 = vmul.f32 256.0, %v1614_v61  ;;  %vm401_vm0 = vweird.f32 %v1614_v61  ;;  %v1447_v31 = vor.u32 %v1582_v28, %v1444_v29  ;;  %v1581_v34 = vld [vmem:[#allocation10 + $0xe4] sm:$0xf0]  ;;  %v1372_v39 = vld [vmem:[#allocation10 + $0x68] sm:$0xf0] }
  0x37   :  { %337 = vmatpush.bf16.msra.mxu0 %v1199_v22  ;;  %v1583_v22 = vld [vmem:[#allocation10 + $0xf4] sm:$0xf0]  ;;  %v1435_v37 = vor.u32 %v1581_v34, %v1434_v33  ;;  %v1577_v60 = vld [vmem:[#allocation10 + $0xc4] sm:$0xf0]  ;;  %v1558_v18 = vld [vmem:[#allocation10 + $0x34] sm:$0xf] }
  0x38   :  { %351 = vmatpush.bf16.msra.mxu1 %v1263_v25  ;;  %v398_v63 = vsub.f32 1.0, %v397_v62  ;;  %v1575_v17 = vld [vmem:[#allocation10 + $0xb4] sm:$0xf0]  ;;  %v1338_v24 = vld [vmem:[#allocation10 + $0x20] sm:$0xf] }
  0x39   :  { %365 = vmatpush.bf16.msra.mxu2 %v1203_v26  ;;  %v1443_v26 = vor.u32 %v1583_v22, %v1442_v19  ;;  %v1348_v19 = vld [vmem:[#allocation10 + $0x38] sm:$0xf0]  ;;  %v1557_v28 = vld [vmem:[#allocation10 + $0x24] sm:$0xf0]  ;;  %v1402_v29 = vld [vmem:[#allocation10 + $0xa0] sm:$0xf] }
  0x3a   :  { %379 = vmatpush.bf16.msra.mxu3 %v1267_v30  ;;  %v399_v0 = vmul.f32 %v1614_v61, %v398_v63  ;;  %v1370_v30 = vld [vmem:[#allocation10 + $0x60] sm:$0xf]  ;;  %v1356_v63 = vld [vmem:[#allocation10 + $0x48] sm:$0xf0]  ;;  %v1556_v33 = vld [vmem:[#allocation10 + $0x24] sm:$0xf] }
  0x3b   :  { %338 = vmatpush.bf16.msra.mxu0 %v1191_v38  ;;  %v1371_v36 = vor.u32 %v1565_v32, %v1370_v30  ;;  %v1564_v38 = vld [vmem:[#allocation10 + $0x64] sm:$0xf]  ;;  %v1573_v30 = vld [vmem:[#allocation10 + $0xa4] sm:$0xf0]  ;;  %v1340_v34 = vld [vmem:[#allocation10 + $0x28] sm:$0xf0] }
  0x3c   :  { %352 = vmatpush.bf16.msra.mxu1 %v1255_v41  ;;  %v400_v1 = vadd.f32 %v1614_v61, %v399_v0  ;;  %v1375_v40 = vor.u32 %v1564_v38, %v1372_v39  ;;  %v1580_v41 = vld [vmem:[#allocation10 + $0xe4] sm:$0xf] }
  0x3d   :  { %366 = vmatpush.bf16.msra.mxu2 %v1195_v42  ;;  %v1436_v42 = vld [vmem:[#allocation10 + $0xe8] sm:$0xf0]  ;;  %v1576_v0 = vld [vmem:[#allocation10 + $0xc4] sm:$0xf] }
  0x3e   :  { %380 = vmatpush.bf16.msra.mxu3 %v1259_v43  ;;  %339 = vmatmul.bf16.vlgmr.msra.gmra.mxu0 %v131_v44  ;;  %v1923_v2 = vsel %vm401_vm0, %v1614_v61, %v400_v1  ;;  %v1362_v43 = vld [vmem:[#allocation10 + $0x50] sm:$0xf]  ;;  %v1560_v61 = vld [vmem:[#allocation10 + $0x44] sm:$0xf]  ;;  %v1420_v1 = vld [vmem:[#allocation10 + $0xc8] sm:$0xf0] }
  0x3f   :  { %353 = vmatmul.bf16.vlgmr.msra.gmra.mxu1 %v137_v45  ;;  %739 = vmatpush.bf16.msrb.mxu0 %v1379_v21  ;;  %v1412_v21 = vld [vmem:[#allocation10 + $0xb8] sm:$0xf0] }
  0x40   :  { %367 = vmatmul.bf16.vlgmr.msra.gmra.mxu2 %v131_v44  ;;  %753 = vmatpush.bf16.msrb.mxu1 %v1443_v26  ;;  %v1439_v44 = vor.u32 %v1580_v41, %v1436_v42  ;;  %v1339_v41 = vor.u32 %v1557_v28, %v1338_v24  ;;  %v1330_v42 = vld [vmem:[#allocation10 + $0x10] sm:$0xf] }
  0x41   :  { %381 = vmatmul.bf16.vlgmr.msra.gmra.mxu3 %v137_v45  ;;  %767 = vmatpush.bf16.msrb.mxu2 %v1383_v27  ;;  %v1563_v45 = vld [vmem:[#allocation10 + $0x54] sm:$0xf0]  ;;  %v1351_v27 = vor.u32 %v1558_v18, %v1348_v19 }
  0x42   :  { %781 = vmatpush.bf16.msrb.mxu3 %v1447_v31 }
  0x43   :  { %740 = vmatpush.bf16.msrb.mxu0 %v1371_v36  ;;  %v1572_v36 = vld [vmem:[#allocation10 + $0xa4] sm:$0xf] }
  0x44   :  { %754 = vmatpush.bf16.msrb.mxu1 %v1435_v37  ;;  %v1404_v37 = vld [vmem:[#allocation10 + $0xa8] sm:$0xf0] }
  0x45   :  { %768 = vmatpush.bf16.msrb.mxu2 %v1375_v40 }
  0x46   :  { %782 = vmatpush.bf16.msrb.mxu3 %v1439_v44 }
  0xbb   :  { %v340_v46 = vpop.f32.mrf.mxu0 }
  0xbc   :  { %v354_v47 = vpop.f32.mrf.mxu1 }
  0xbd   :  { %v355_v48 = vadd.f32 %v354_v47, %v340_v46  ;;  %v1426_v46 = vld [vmem:[#allocation10 + $0xd0] sm:$0xf]  ;;  %v1579_v47 = vld [vmem:[#allocation10 + $0xd4] sm:$0xf0] }
  0xc3   :  { %v368_v49 = vpop.f32.mrf.mxu2  ;;  %v342_v53 = vpop.f32.mrf.mxu0 }
  0xc4   :  { %v382_v50 = vpop.f32.mrf.mxu3  ;;  %v356_v54 = vpop.f32.mrf.mxu1 }
  0xc5   :  { %v383_v51 = vadd.f32 %v382_v50, %v368_v49  ;;  %v357_v57 = vadd.f32 %v356_v54, %v342_v53  ;;  %v1562_v49 = vld [vmem:[#allocation10 + $0x54] sm:$0xf]  ;;  %v1364_v50 = vld [vmem:[#allocation10 + $0x58] sm:$0xf0] }
  0xc6   :  { %v1367_v53 = vor.u32 %v1562_v49, %v1364_v50  ;;  %v1428_v54 = vld [vmem:[#allocation10 + $0xd8] sm:$0xf0]  ;;  %v1571_v49 = vld [vmem:[#allocation10 + $0x94] sm:$0xf0] }
  0xc7   :  { %v390_v52 = vadd.f32 %v383_v51, %v355_v48 }
  0xc8   :  { %769 = vmatpush.bf16.msrb.mxu2 %v1367_v53  ;;  %v1554_v53 = vld [vmem:[#allocation10 + $0x14] sm:$0xf] }
  0xc9   :  { %391 = vadd.xlane.f32.xlu0 %v390_v52  ;;  %v1427_v52 = vor.u32 %v1579_v47, %v1426_v46  ;;  %v1343_v46 = vor.u32 %v1556_v33, %v1340_v34  ;;  %v1555_v47 = vld [vmem:[#allocation10 + $0x14] sm:$0xf0] }
  0xcb   :  { %v370_v55 = vpop.f32.mrf.mxu2  ;;  %755 = vmatpush.bf16.msrb.mxu1 %v1427_v52  ;;  %v1407_v52 = vor.u32 %v1572_v36, %v1404_v37 }
  0xcc   :  { %v384_v56 = vpop.f32.mrf.mxu3 }
  0xcd   :  { %v385_v58 = vadd.f32 %v384_v56, %v370_v55  ;;  %v1354_v55 = vld [vmem:[#allocation10 + $0x40] sm:$0xf]  ;;  %v1561_v56 = vld [vmem:[#allocation10 + $0x44] sm:$0xf0] }
  0xcf   :  { %v393_v59 = vadd.f32 %v385_v58, %v357_v57 }
  0xd1   :  { %394 = vadd.xlane.f32.xlu0 %v393_v59  ;;  %v1418_v59 = vld [vmem:[#allocation10 + $0xc0] sm:$0xf] }
 0x13c   :  { %v392_v3 = vpop.xlane.xlu0 %391 }
 0x13d   :  { %v403_v4 = vmul.f32 %v1923_v2, %v392_v3  ;;  %v1355_v3 = vor.u32 %v1561_v56, %v1354_v55  ;;  %v1570_v55 = vld [vmem:[#allocation10 + $0x94] sm:$0xf]  ;;  %v1396_v56 = vld [vmem:[#allocation10 + $0x98] sm:$0xf0] }
 0x13f   :  { %v1926_v5 = vsub.f32 %v355_v48, %v403_v4  ;;  %v1928_v6 = vsub.f32 %v383_v51, %v403_v4  ;;  %v1363_v48 = vor.u32 %v1563_v45, %v1362_v43  ;;  %v1578_v51 = vld [vmem:[#allocation10 + $0xd4] sm:$0xf]  ;;  %v1346_v4 = vld [vmem:[#allocation10 + $0x30] sm:$0xf]  ;;  %v1403_v45 = vor.u32 %v1573_v30, %v1402_v29 }
 0x140   :  { %v1961_v43 = vld [vmem:[#allocation8 + $0x1] ss:$8 sm:$0x3] }
 0x141   :  { %v409_v7 = vmul.f32 %v1926_v5, %v1926_v5  ;;  %v410_v8 = vmul.f32 %v1928_v6, %v1928_v6  ;;  %741 = vmatpush.bf16.msrb.mxu0 %v1363_v48  ;;  %v1394_v48 = vld [vmem:[#allocation10 + $0x90] sm:$0xf] }
 0x143   :  { %v413_v9 = vadd.f32 %v410_v8, %v409_v7 }
 0x144   :  { %v395_v10 = vpop.xlane.xlu0 %394 }
 0x145   :  { %v404_v11 = vmul.f32 %v1923_v2, %v395_v10  ;;  %414 = vadd.xlane.f32.xlu1 %v413_v9  ;;  %v1419_v9 = vor.u32 %v1577_v60, %v1418_v59  ;;  %v1359_v10 = vor.u32 %v1560_v61, %v1356_v63  ;;  %742 = vmatpush.bf16.msrb.mxu0 %v1355_v3  ;;  %v1553_v3 = vld [vmem:[#allocation10 + $0x4] sm:$0xf0] }
 0x146   :  { %v1395_v61 = vor.u32 %v1571_v49, %v1394_v48 }
 0x147   :  { %v1935_v12 = vsub.f32 %v357_v57, %v404_v11  ;;  %v1937_v13 = vsub.f32 %v385_v58, %v404_v11  ;;  %v1431_v58 = vor.u32 %v1578_v51, %v1428_v54  ;;  %v1559_v11 = vld [vmem:[#allocation10 + $0x34] sm:$0xf0]  ;;  %756 = vmatpush.bf16.msrb.mxu1 %v1419_v9  ;;  %770 = vmatpush.bf16.msrb.mxu2 %v1359_v10  ;;  %v1332_v54 = vld [vmem:[#allocation10 + $0x18] sm:$0xf0]  ;;  %v1569_v9 = vld [vmem:[#allocation10 + $0x84] sm:$0xf0] }
 0x148   :  { %v1347_v23 = vor.u32 %v1559_v11, %v1346_v4  ;;  %v1386_v4 = vld [vmem:[#allocation10 + $0x80] sm:$0xf]  ;;  %v1399_v11 = vor.u32 %v1570_v55, %v1396_v56 }
 0x149   :  { %v411_v14 = vmul.f32 %v1935_v12, %v1935_v12  ;;  %v412_v15 = vmul.f32 %v1937_v13, %v1937_v13  ;;  %783 = vmatpush.bf16.msrb.mxu3 %v1431_v58  ;;  %v458_v58 = vperm.slane %v1961_v43, 1  ;;  %v1387_v19 = vor.u32 %v1569_v9, %v1386_v4 }
 0x14a   :  { %743 = vmatpush.bf16.msrb.mxu0 %v1347_v23 }
 0x14b   :  { %v416_v16 = vadd.f32 %v412_v15, %v411_v14  ;;  %v1410_v14 = vld [vmem:[#allocation10 + $0xb0] sm:$0xf]  ;;  %771 = vmatpush.bf16.msrb.mxu2 %v1351_v27 }
 0x14c   :  { %v1411_v26 = vor.u32 %v1575_v17, %v1410_v14  ;;  %v1552_v14 = vld [vmem:[#allocation10 + $0x4] sm:$0xf] }
 0x14d   :  { %417 = vadd.xlane.f32.xlu1 %v416_v16  ;;  %v1423_v16 = vor.u32 %v1576_v0, %v1420_v1  ;;  %v1335_v1 = vor.u32 %v1554_v53, %v1332_v54 }
 0x14e   :  { %757 = vmatpush.bf16.msrb.mxu1 %v1411_v26  ;;  %744 = vmatpush.bf16.msrb.mxu0 %v1339_v41 }
 0x14f   :  { %784 = vmatpush.bf16.msrb.mxu3 %v1423_v16  ;;  %772 = vmatpush.bf16.msrb.mxu2 %v1343_v46  ;;  %v1388_v16 = vld [vmem:[#allocation10 + $0x88] sm:$0xf0] }
 0x152   :  { %758 = vmatpush.bf16.msrb.mxu1 %v1403_v45 }
 0x153   :  { %773 = vmatpush.bf16.msrb.mxu2 %v1335_v1 }
 0x156   :  { %759 = vmatpush.bf16.msrb.mxu1 %v1395_v61 }
 0x15a   :  { %760 = vmatpush.bf16.msrb.mxu1 %v1387_v19 }
 0x1b8   :  { %v415_v20 = vpop.xlane.xlu1 %414 }
 0x1b9   :  { %v419_v25 = vmul.f32 %v415_v20, %v1923_v2  ;;  %v1574_v20 = vld [vmem:[#allocation10 + $0xb4] sm:$0xf] }
 0x1ba   :  { %v1415_v32 = vor.u32 %v1574_v20, %v1412_v21 }
 0x1bb   :  { %v1944_v35 = vadd.f32 0.001, %v419_v25  ;;  %v1956_v25 = vld [vmem:[#allocation8] ss:$8 sm:$0x3] }
 0x1bc   :  { %v448_v38 = vperm.slane %v1956_v25, 0  ;;  %v449_v39 = vperm.slane %v1956_v25, 1  ;;  %785 = vmatpush.bf16.msrb.mxu3 %v1415_v32 }
 0x1bd   :  { %1615 = vrsqrt.f32 %v1944_v35  ;;  %vm429_vm2 = vweird.f32 %v1944_v35 }
 0x1c0   :  { %v418_v57 = vpop.xlane.xlu1 %417  ;;  %786 = vmatpush.bf16.msrb.mxu3 %v1407_v52 }
 0x1c1   :  { %v420_v62 = vmul.f32 %v418_v57, %v1923_v2  ;;  %v457_v57 = vperm.slane %v1961_v43, 0 }
 0x1c3   :  { %v1948_v7 = vpop.eup %1615  ;;  %v1950_v8 = vadd.f32 0.001, %v420_v62  ;;  %v1322_v62 = vld [vmem:[#allocation10] sm:$0xf] }
 0x1c4   :  { %v424_v15 = vmul.f32 %v1948_v7, %v1944_v35  ;;  %vm430_vm1 = vweird.f32 %v1948_v7  ;;  %v1331_v35 = vor.u32 %v1555_v47, %v1330_v42  ;;  %v1323_v18 = vor.u32 %v1553_v3, %v1322_v62  ;;  %787 = vmatpush.bf16.msrb.mxu3 %v1399_v11 }
 0x1c5   :  { %1617 = vrsqrt.f32 %v1950_v8  ;;  %vm431_vm3 = vmor %vm429_vm2, %vm430_vm1  ;;  %vm439_vm5 = vweird.f32 %v1950_v8 }
 0x1c6   :  { %v425_v22 = vmul.f32 %v1948_v7, %v424_v15  ;;  %v1568_v15 = vld [vmem:[#allocation10 + $0x84] sm:$0xf]  ;;  %745 = vmatpush.bf16.msrb.mxu0 %v1331_v35 }
 0x1c7   :  { %v1391_v24 = vor.u32 %v1568_v15, %v1388_v16 }
 0x1c8   :  { %v426_v31 = vmul.f32 0.5, %v425_v22 }
 0x1c9   :  { %788 = vmatpush.bf16.msrb.mxu3 %v1391_v24 }
 0x1ca   :  { %v427_v40 = vsub.f32 1.5, %v426_v31  ;;  %746 = vmatpush.bf16.msrb.mxu0 %v1323_v18 }
 0x1cb   :  { %v1618_v44 = vpop.eup %1617 }
 0x1cc   :  { %v428_v50 = vmul.f32 %v1948_v7, %v427_v40  ;;  %v434_v51 = vmul.f32 %v1618_v44, %v1950_v8  ;;  %vm440_vm4 = vweird.f32 %v1618_v44 }
 0x1cd   :  { %vm441_vm6 = vmor %vm439_vm5, %vm440_vm4 }
 0x1ce   :  { %v432_v59 = vsel %vm431_vm3, %v1948_v7, %v428_v50  ;;  %v435_v60 = vmul.f32 %v1618_v44, %v434_v51  ;;  %v1324_v7 = vld [vmem:[#allocation10 + $0x8] sm:$0xf0] }
 0x1cf   :  { %v443_v63 = vmul.f32 %v432_v59, %v1926_v5  ;;  %v444_v0 = vmul.f32 %v432_v59, %v1928_v6  ;;  %v1327_v20 = vor.u32 %v1552_v14, %v1324_v7 }
 0x1d0   :  { %v436_v10 = vmul.f32 0.5, %v435_v60 }
 0x1d1   :  { %v452_v17 = vmul.f32 %v448_v38, %v443_v63  ;;  %v453_v5 = vmul.f32 %v449_v39, %v444_v0  ;;  %774 = vmatpush.bf16.msrb.mxu2 %v1327_v20 }
 0x1d2   :  { %v437_v6 = vsub.f32 1.5, %v436_v10 }
 0x1d3   :  { %v1977_v21 = vadd.f32 %v457_v57, %v452_v17  ;;  %v1979_v22 = vadd.f32 %v458_v58, %v453_v5 }
 0x1d4   :  { %v438_v23 = vmul.f32 %v1618_v44, %v437_v6 }
 0x1d5   :  { %v1316_v26 = vmul.f32 -1.442695, %v1977_v21  ;;  %v1317_v27 = vmul.f32 -1.442695, %v1979_v22 }
 0x1d6   :  { %v442_v28 = vsel %vm441_vm6, %v1618_v44, %v438_v23 }
 0x1d7   :  { %v445_v29 = vmul.f32 %v442_v28, %v1935_v12  ;;  %v446_v30 = vmul.f32 %v442_v28, %v1937_v13  ;;  %1619 = vpow2.f32 %v1316_v26 }
 0x1d8   :  { %1621 = vpow2.f32 %v1317_v27 }
 0x1d9   :  { %v454_v8 = vmul.f32 %v448_v38, %v445_v29  ;;  %v455_v31 = vmul.f32 %v449_v39, %v446_v30 }
 0x1db   :  { %v1990_v32 = vadd.f32 %v457_v57, %v454_v8  ;;  %v1992_v33 = vadd.f32 %v458_v58, %v455_v31 }
 0x1dd   :  { %v1620_v34 = vpop.eup %1619  ;;  %v1318_v12 = vmul.f32 -1.442695, %v1990_v32  ;;  %v1319_v13 = vmul.f32 -1.442695, %v1992_v33 }
 0x1de   :  { %v1622_v36 = vpop.eup %1621  ;;  %v477_v37 = vadd.f32 1.0, %v1620_v34 }
 0x1df   :  { %1623 = vpow2.f32 %v1318_v12  ;;  %v478_v40 = vadd.f32 1.0, %v1622_v36 }
 0x1e0   :  { %1625 = vrcp.f32 %v477_v37  ;;  %vm486_vm8 = vweird.f32 %v477_v37  ;;  %v490_v53 = vand.u32 2147483647, %v477_v37  ;;  %v492_v54 = vand.u32 2147483648, %v477_v37 }
 0x1e1   :  { %1627 = vpow2.f32 %v1319_v13  ;;  %vm501_vm9 = vweird.f32 %v478_v40  ;;  %v505_v58 = vand.u32 2147483647, %v478_v40  ;;  %v507_v35 = vand.u32 2147483648, %v478_v40 }
 0x1e2   :  { %1629 = vrcp.f32 %v478_v40  ;;  %vm491_vm13 = vcmp.eq.f32.partialorder %v490_v53, 8.507059e+37  ;;  %v493_v1 = vor.u32 1.1754944e-38, %v492_v54 }
 0x1e3   :  { %v508_v5 = vor.u32 1.1754944e-38, %v507_v35  ;;  %vm506_vm3 = vcmp.eq.f32.partialorder %v505_v58, 8.507059e+37  ;;  %v1599_v58 = vld [vmem:[#allocation11 + $0x78] sm:$0xff]  ;;  %v1598_v35 = vld [vmem:[#allocation11 + $0x70] sm:$0xff] }
 0x1e4   :  { %1095 = vmatpush.bf16.msra.mxu1 %v1599_v58 }
 0x1e5   :  { %v1624_v38 = vpop.eup %1623 }
 0x1e6   :  { %v1626_v41 = vpop.eup %1625  ;;  %v479_v25 = vadd.f32 1.0, %v1624_v38 }
 0x1e7   :  { %v1628_v39 = vpop.eup %1627  ;;  %v482_v42 = vmul.f32 %v1626_v41, %v477_v37  ;;  %vm487_vm7 = vweird.f32 %v1626_v41 }
 0x1e8   :  { %v1630_v43 = vpop.eup %1629  ;;  %1631 = vrcp.f32 %v479_v25  ;;  %v480_v45 = vadd.f32 1.0, %v1628_v39  ;;  %v522_v57 = vand.u32 2147483648, %v479_v25  ;;  %vm1996_vm10 = vmor %vm486_vm8, %vm487_vm7  ;;  %v520_v0 = vand.u32 2147483647, %v479_v25  ;;  %1096 = vmatpush.bf16.msra.mxu1 %v1598_v35 }
 0x1e9   :  { %v483_v44 = vsub.f32 1.0, %v482_v42  ;;  %v497_v46 = vmul.f32 %v1630_v43, %v478_v40  ;;  %vm502_vm11 = vweird.f32 %v1630_v43  ;;  %vm516_vm14 = vweird.f32 %v479_v25 }
 0x1ea   :  { %1633 = vrcp.f32 %v480_v45  ;;  %v523_v9 = vor.u32 1.1754944e-38, %v522_v57  ;;  %vm2003_vm15 = vmor %vm501_vm9, %vm502_vm11  ;;  %v535_v11 = vand.u32 2147483647, %v480_v45  ;;  %v537_v14 = vand.u32 2147483648, %v480_v45  ;;  %v1591_v57 = vld [vmem:[#allocation11 + $0x38] sm:$0xff] }
 0x1eb   :  { %v484_v47 = vmul.f32 %v1626_v41, %v483_v44  ;;  %v498_v48 = vsub.f32 1.0, %v497_v46  ;;  %vm521_vm2 = vcmp.eq.f32.partialorder %v520_v0, 8.507059e+37  ;;  %vm531_vm4 = vweird.f32 %v480_v45  ;;  %1081 = vmatpush.bf16.msra.mxu0 %v1591_v57 }
 0x1ec   :  { %v538_v24 = vor.u32 1.1754944e-38, %v537_v14  ;;  %vm536_vm6 = vcmp.eq.f32.partialorder %v535_v11, 8.507059e+37  ;;  %v1587_v14 = vld [vmem:[#allocation11 + $0x18] sm:$0xff] }
 0x1ed   :  { %v499_v50 = vmul.f32 %v1630_v43, %v498_v48  ;;  %v485_v51 = vadd.f32 %v1626_v41, %v484_v47 }
 0x1ee   :  { %v1632_v49 = vpop.eup %1631 }
 0x1ef   :  { %v512_v52 = vmul.f32 %v1632_v49, %v479_v25  ;;  %v500_v60 = vadd.f32 %v1630_v43, %v499_v50  ;;  %v489_v62 = vsel %vm1996_vm10, %v1626_v41, %v485_v51  ;;  %vm517_vm12 = vweird.f32 %v1632_v49 }
 0x1f0   :  { %v1634_v55 = vpop.eup %1633  ;;  %v494_v7 = vsel %vm491_vm13, %v493_v1, %v489_v62  ;;  %vm518_vm0 = vmor %vm516_vm14, %vm517_vm12  ;;  %v1597_v62 = vld [vmem:[#allocation11 + $0x68] sm:$0xff] }
 0x1f1   :  { %v513_v56 = vsub.f32 1.0, %v512_v52  ;;  %v527_v61 = vmul.f32 %v1634_v55, %v480_v45  ;;  %v504_v15 = vsel %vm2003_vm15, %v1630_v43, %v500_v60  ;;  %vm532_vm1 = vweird.f32 %v1634_v55  ;;  %v1590_v60 = vld [vmem:[#allocation11 + $0x30] sm:$0xff]  ;;  %1097 = vmatpush.bf16.msra.mxu1 %v1597_v62 }
 0x1f2   :  { %v541_v19 = vmul.f32 %v494_v7, %v1977_v21  ;;  %v509_v23 = vsel %vm506_vm3, %v508_v5, %v504_v15  ;;  %vm533_vm5 = vmor %vm531_vm4, %vm532_vm1  ;;  %1082 = vmatpush.bf16.msra.mxu0 %v1590_v60  ;;  %v1595_v7 = vld [vmem:[#allocation11 + $0x58] sm:$0xff] }
 0x1f3   :  { %v514_v63 = vmul.f32 %v1632_v49, %v513_v56  ;;  %v528_v3 = vsub.f32 1.0, %v527_v61  ;;  %v542_v29 = vmul.f32 %v509_v23, %v1979_v22  ;;  %v1589_v61 = vld [vmem:[#allocation11 + $0x28] sm:$0xff] }
 0x1f5   :  { %v515_v4 = vadd.f32 %v1632_v49, %v514_v63  ;;  %v529_v16 = vmul.f32 %v1634_v55, %v528_v3 }
 0x1f6   :  { %1083 = vmatpush.bf16.msra.mxu0 %v1589_v61 }
 0x1f7   :  { %v519_v17 = vsel %vm518_vm0, %v1632_v49, %v515_v4  ;;  %v530_v18 = vadd.f32 %v1634_v55, %v529_v16  ;;  %v1588_v4 = vld [vmem:[#allocation11 + $0x20] sm:$0xff]  ;;  %v796_v16 = vld [vmem:[#allocation8 + $0x2] ss:$8 sm:$0x3] }
 0x1f8   :  { %v524_v6 = vsel %vm521_vm2, %v523_v9, %v519_v17  ;;  %v1596_v9 = vld [vmem:[#allocation11 + $0x60] sm:$0xff]  ;;  %v850_v23 = vperm.slane %v796_v16, 0 }
 0x1f9   :  { %v543_v20 = vmul.f32 %v524_v6, %v1990_v32  ;;  %v534_v26 = vsel %vm533_vm5, %v1634_v55, %v530_v18  ;;  %1098 = vmatpush.bf16.msra.mxu1 %v1596_v9  ;;  %v1594_v6 = vld [vmem:[#allocation11 + $0x50] sm:$0xff] }
 0x1fa   :  { %v539_v28 = vsel %vm536_vm6, %v538_v24, %v534_v26  ;;  %1084 = vmatpush.bf16.msra.mxu0 %v1588_v4  ;;  %v851_v24 = vperm.slane %v796_v16, 1 }
 0x1fb   :  { %v545_v27 = vpack.c.bf16 %v543_v20, %v541_v19  ;;  %v544_v30 = vmul.f32 %v539_v28, %v1992_v33  ;;  %v798_v20 = vld [vmem:[#allocation8 + $0x3] ss:$8 sm:$0x3] }
 0x1fd   :  { %747 = vmatmul.bf16.vlgmr.msrb.gmra.mxu0 %v545_v27  ;;  %775 = vmatmul.bf16.vlgmr.msrb.gmra.mxu2 %v545_v27  ;;  %v546_v8 = vpack.c.bf16 %v544_v30, %v542_v29  ;;  %v1585_v30 = vld [vmem:[#allocation11 + $0x8] sm:$0xff] }
 0x1fe   :  { %1085 = vmatpush.bf16.msra.mxu0 %v1587_v14  ;;  %1099 = vmatpush.bf16.msra.mxu1 %v1595_v7 }
 0x1ff   :  { %761 = vmatmul.bf16.vlgmr.msrb.gmra.mxu1 %v546_v8  ;;  %789 = vmatmul.bf16.vlgmr.msrb.gmra.mxu3 %v546_v8  ;;  %v1593_v8 = vld [vmem:[#allocation11 + $0x48] sm:$0xff] }
 0x202   :  { %1100 = vmatpush.bf16.msra.mxu1 %v1594_v6 }
 0x206   :  { %1101 = vmatpush.bf16.msra.mxu1 %v1593_v8 }
 0x27a   :  { %v748_v31 = vpop.f32.mrf.mxu0 }
 0x27c   :  { %v762_v21 = vpop.f32.mrf.mxu1 }
 0x27d   :  { %v763_v12 = vadd.f32 %v762_v21, %v748_v31  ;;  %v859_v31 = vperm.slane %v798_v20, 0  ;;  %v860_v21 = vperm.slane %v798_v20, 1 }
 0x280   :  { %v776_v34 = vpop.f32.mrf.mxu2 }
 0x282   :  { %v790_v32 = vpop.f32.mrf.mxu3  ;;  %v750_v37 = vpop.f32.mrf.mxu0 }
 0x283   :  { %v791_v13 = vadd.f32 %v790_v32, %v776_v34 }
 0x284   :  { %v764_v40 = vpop.f32.mrf.mxu1 }
 0x285   :  { %v799_v36 = vadd.f32 %v791_v13, %v763_v12  ;;  %v765_v22 = vadd.f32 %v764_v40, %v750_v37  ;;  %v1592_v37 = vld [vmem:[#allocation11 + $0x40] sm:$0xff] }
 0x286   :  { %1102 = vmatpush.bf16.msra.mxu1 %v1592_v37 }
 0x287   :  { %800 = vadd.xlane.f32.xlu2 %v799_v36  ;;  %v1584_v36 = vld [vmem:[#allocation11] sm:$0xff] }
 0x288   :  { %v778_v38 = vpop.f32.mrf.mxu2 }
 0x28a   :  { %v792_v41 = vpop.f32.mrf.mxu3 }
 0x28b   :  { %v793_v25 = vadd.f32 %v792_v41, %v778_v38 }
 0x28d   :  { %v802_v33 = vadd.f32 %v793_v25, %v765_v22 }
 0x28f   :  { %803 = vadd.xlane.f32.xlu2 %v802_v33 }
 0x2fa   :  { %v801_v39 = vpop.xlane.xlu2 %800 }
 0x2fb   :  { %v805_v42 = vmul.f32 %v801_v39, %v1923_v2 }
 0x2fd   :  { %v807_v43 = vsub.f32 %v763_v12, %v805_v42  ;;  %v808_v44 = vsub.f32 %v791_v13, %v805_v42 }
 0x2ff   :  { %v811_v45 = vmul.f32 %v807_v43, %v807_v43  ;;  %v812_v46 = vmul.f32 %v808_v44, %v808_v44 }
 0x301   :  { %v815_v47 = vadd.f32 %v812_v46, %v811_v45 }
 0x302   :  { %v804_v48 = vpop.xlane.xlu2 %803 }
 0x303   :  { %v806_v49 = vmul.f32 %v804_v48, %v1923_v2  ;;  %816 = vadd.xlane.f32.xlu0 %v815_v47 }
 0x305   :  { %v2015_v50 = vsub.f32 %v765_v22, %v806_v49  ;;  %v2017_v51 = vsub.f32 %v793_v25, %v806_v49 }
 0x307   :  { %v813_v52 = vmul.f32 %v2015_v50, %v2015_v50  ;;  %v814_v53 = vmul.f32 %v2017_v51, %v2017_v51 }
 0x309   :  { %v818_v54 = vadd.f32 %v814_v53, %v813_v52 }
 0x30b   :  { %819 = vadd.xlane.f32.xlu1 %v818_v54 }
 0x376   :  { %v817_v55 = vpop.xlane.xlu0 %816 }
 0x377   :  { %v821_v56 = vmul.f32 %v817_v55, %v1923_v2 }
 0x379   :  { %v823_v59 = vadd.f32 0.001, %v821_v56 }
 0x37b   :  { %1635 = vrsqrt.f32 %v823_v59  ;;  %vm831_vm8 = vweird.f32 %v823_v59 }
 0x37e   :  { %v820_v63 = vpop.xlane.xlu1 %819 }
 0x37f   :  { %v822_v0 = vmul.f32 %v820_v63, %v1923_v2  ;;  %v1586_v2 = vld [vmem:[#allocation11 + $0x10] sm:$0xff] }
 0x380   :  { %1086 = vmatpush.bf16.msra.mxu0 %v1586_v2 }
 0x381   :  { %v1636_v1 = vpop.eup %1635  ;;  %v824_v3 = vadd.f32 0.001, %v822_v0 }
 0x382   :  { %v826_v10 = vmul.f32 %v1636_v1, %v823_v59  ;;  %vm832_vm7 = vweird.f32 %v1636_v1 }
 0x383   :  { %1637 = vrsqrt.f32 %v824_v3  ;;  %vm833_vm9 = vmor %vm831_vm8, %vm832_vm7  ;;  %vm841_vm11 = vweird.f32 %v824_v3 }
 0x384   :  { %v827_v11 = vmul.f32 %v1636_v1, %v826_v10  ;;  %1087 = vmatpush.bf16.msra.mxu0 %v1585_v30 }
 0x386   :  { %v828_v15 = vmul.f32 0.5, %v827_v11 }
 0x388   :  { %v829_v17 = vsub.f32 1.5, %v828_v15  ;;  %1088 = vmatpush.bf16.msra.mxu0 %v1584_v36 }
 0x389   :  { %v1638_v5 = vpop.eup %1637 }
 0x38a   :  { %v830_v18 = vmul.f32 %v1636_v1, %v829_v17  ;;  %v836_v19 = vmul.f32 %v1638_v5, %v824_v3  ;;  %vm842_vm10 = vweird.f32 %v1638_v5 }
 0x38b   :  { %vm843_vm12 = vmor %vm841_vm11, %vm842_vm10 }
 0x38c   :  { %v834_v26 = vsel %vm833_vm9, %v1636_v1, %v830_v18  ;;  %v837_v27 = vmul.f32 %v1638_v5, %v836_v19 }
 0x38d   :  { %v845_v28 = vmul.f32 %v834_v26, %v807_v43  ;;  %v846_v29 = vmul.f32 %v834_v26, %v808_v44 }
 0x38e   :  { %v838_v34 = vmul.f32 0.5, %v837_v27 }
 0x38f   :  { %v854_v32 = vmul.f32 %v850_v23, %v845_v28  ;;  %v855_v12 = vmul.f32 %v851_v24, %v846_v29 }
 0x390   :  { %v839_v13 = vsub.f32 1.5, %v838_v34 }
 0x391   :  { %v2025_v40 = vadd.f32 %v859_v31, %v854_v32  ;;  %v2027_v38 = vadd.f32 %v860_v21, %v855_v12 }
 0x392   :  { %v840_v41 = vmul.f32 %v1638_v5, %v839_v13 }
 0x393   :  { %v1448_v22 = vmul.f32 -1.442695, %v2025_v40  ;;  %v1449_v25 = vmul.f32 -1.442695, %v2027_v38 }
 0x394   :  { %v844_v33 = vsel %vm843_vm12, %v1638_v5, %v840_v41 }
 0x395   :  { %v847_v39 = vmul.f32 %v844_v33, %v2015_v50  ;;  %v848_v42 = vmul.f32 %v844_v33, %v2017_v51  ;;  %1639 = vpow2.f32 %v1448_v22 }
 0x396   :  { %1641 = vpow2.f32 %v1449_v25 }
 0x397   :  { %v856_v43 = vmul.f32 %v850_v23, %v847_v39  ;;  %v857_v44 = vmul.f32 %v851_v24, %v848_v42 }
 0x399   :  { %v2033_v45 = vadd.f32 %v859_v31, %v856_v43  ;;  %v2035_v46 = vadd.f32 %v860_v21, %v857_v44  ;;  %v1109_v43 = vlaneseq }
 0x39b   :  { %v1640_v47 = vpop.eup %1639  ;;  %v1450_v48 = vmul.f32 -1.442695, %v2033_v45  ;;  %v1451_v49 = vmul.f32 -1.442695, %v2035_v46 }
 0x39c   :  { %v1642_v52 = vpop.eup %1641  ;;  %v879_v53 = vadd.f32 1.0, %v1640_v47  ;;  %v2059_v47 = vand.u32 127, %v1109_v43 }
 0x39d   :  { %1643 = vpow2.f32 %v1450_v48  ;;  %v880_v50 = vadd.f32 1.0, %v1642_v52 }
 0x39e   :  { %1645 = vrcp.f32 %v879_v53  ;;  %vm888_vm14 = vweird.f32 %v879_v53  ;;  %v892_v4 = vand.u32 2147483647, %v879_v53  ;;  %v894_v9 = vand.u32 2147483648, %v879_v53 }
 0x39f   :  { %1647 = vpow2.f32 %v1451_v49  ;;  %vm903_vm15 = vweird.f32 %v880_v50  ;;  %v907_v7 = vand.u32 2147483647, %v880_v50  ;;  %v909_v17 = vand.u32 2147483648, %v880_v50 }
 0x3a0   :  { %1649 = vrcp.f32 %v880_v50  ;;  %vm893_vm3 = vcmp.eq.f32.partialorder %v892_v4, 8.507059e+37  ;;  %v895_v19 = vor.u32 1.1754944e-38, %v894_v9 }
 0x3a1   :  { %v910_v21 = vor.u32 1.1754944e-38, %v909_v17  ;;  %vm908_vm9 = vcmp.eq.f32.partialorder %v907_v7, 8.507059e+37 }
 0x3a3   :  { %v1644_v51 = vpop.eup %1643 }
 0x3a4   :  { %v1646_v54 = vpop.eup %1645  ;;  %v881_v55 = vadd.f32 1.0, %v1644_v51 }
 0x3a5   :  { %v1648_v56 = vpop.eup %1647  ;;  %v884_v57 = vmul.f32 %v1646_v54, %v879_v53  ;;  %vm889_vm13 = vweird.f32 %v1646_v54 }
 0x3a6   :  { %v1650_v58 = vpop.eup %1649  ;;  %1651 = vrcp.f32 %v881_v55  ;;  %v882_v60 = vadd.f32 1.0, %v1648_v56  ;;  %v924_v14 = vand.u32 2147483648, %v881_v55  ;;  %vm2039_vm0 = vmor %vm888_vm14, %vm889_vm13  ;;  %v922_v18 = vand.u32 2147483647, %v881_v55 }
 0x3a7   :  { %v885_v59 = vsub.f32 1.0, %v884_v57  ;;  %v899_v35 = vmul.f32 %v1650_v58, %v880_v50  ;;  %vm904_vm1 = vweird.f32 %v1650_v58  ;;  %vm918_vm4 = vweird.f32 %v881_v55 }
 0x3a8   :  { %1653 = vrcp.f32 %v882_v60  ;;  %v925_v24 = vor.u32 1.1754944e-38, %v924_v14  ;;  %vm2046_vm5 = vmor %vm903_vm15, %vm904_vm1  ;;  %v937_v27 = vand.u32 2147483647, %v882_v60  ;;  %v939_v28 = vand.u32 2147483648, %v882_v60 }
 0x3a9   :  { %v886_v61 = vmul.f32 %v1646_v54, %v885_v59  ;;  %v900_v62 = vsub.f32 1.0, %v899_v35  ;;  %vm923_vm8 = vcmp.eq.f32.partialorder %v922_v18, 8.507059e+37  ;;  %vm933_vm10 = vweird.f32 %v882_v60 }
 0x3aa   :  { %v940_v37 = vor.u32 1.1754944e-38, %v939_v28  ;;  %vm938_vm12 = vcmp.eq.f32.partialorder %v937_v27, 8.507059e+37  ;;  %vm1111_vm13 = vcmp.lt.s32.totalorder %v2059_v47, 6 }
 0x3ab   :  { %v901_v0 = vmul.f32 %v1650_v58, %v900_v62  ;;  %v887_v1 = vadd.f32 %v1646_v54, %v886_v61 }
 0x3ac   :  { %v1652_v63 = vpop.eup %1651 }
 0x3ad   :  { %v914_v3 = vmul.f32 %v1652_v63, %v881_v55  ;;  %v902_v16 = vadd.f32 %v1650_v58, %v901_v0  ;;  %v891_v2 = vsel %vm2039_vm0, %v1646_v54, %v887_v1  ;;  %vm919_vm2 = vweird.f32 %v1652_v63 }
 0x3ae   :  { %v1654_v10 = vpop.eup %1653  ;;  %v896_v29 = vsel %vm893_vm3, %v895_v19, %v891_v2  ;;  %vm920_vm6 = vmor %vm918_vm4, %vm919_vm2 }
 0x3af   :  { %v915_v11 = vsub.f32 1.0, %v914_v3  ;;  %v929_v5 = vmul.f32 %v1654_v10, %v882_v60  ;;  %v906_v30 = vsel %vm2046_vm5, %v1650_v58, %v902_v16  ;;  %vm934_vm7 = vweird.f32 %v1654_v10 }
 0x3b0   :  { %v943_v12 = vmul.f32 %v896_v29, %v2025_v40  ;;  %v911_v36 = vsel %vm908_vm9, %v910_v21, %v906_v30  ;;  %vm935_vm11 = vmor %vm933_vm10, %vm934_vm7  ;;  %v1612_v40 = vld [vmem:[%s2082_s6] ss:$0 sm:$0xff]  ;;  %s1852_s6 = smov [#allocation13]  }
 0x3b1   :  { %v916_v6 = vmul.f32 %v1652_v63, %v915_v11  ;;  %v930_v20 = vsub.f32 1.0, %v929_v5  ;;  %v944_v33 = vmul.f32 %v911_v36, %v2027_v38  ;;  %s1170_s8 = sshll.u32 %s1852_s6, 4  ;;  %s1171_s8 = int_to_ptr.vmem [resolvable:$true] %s1170_s8 }
 0x3b3   :  { %v917_v23 = vadd.f32 %v1652_v63, %v916_v6  ;;  %v931_v8 = vmul.f32 %v1654_v10, %v930_v20 }
 0x3b5   :  { %v921_v31 = vsel %vm920_vm6, %v1652_v63, %v917_v23  ;;  %v932_v32 = vadd.f32 %v1654_v10, %v931_v8 }
 0x3b6   :  { %v926_v34 = vsel %vm923_vm8, %v925_v24, %v921_v31 }
 0x3b7   :  { %v945_v13 = vmul.f32 %v926_v34, %v2033_v45  ;;  %v936_v41 = vsel %vm935_vm11, %v1654_v10, %v932_v32 }
 0x3b8   :  { %v941_v25 = vsel %vm938_vm12, %v940_v37, %v936_v41 }
 0x3b9   :  { %v947_v22 = vpack.c.bf16 %v945_v13, %v943_v12  ;;  %v946_v39 = vmul.f32 %v941_v25, %v2035_v46 }
 0x3bb   :  { %1089 = vmatmul.bf16.vlgmr.msra.gmra.mxu0 %v947_v22  ;;  %v948_v42 = vpack.c.bf16 %v946_v39, %v944_v33 }
 0x3bd   :  { %1103 = vmatmul.bf16.vlgmr.msra.gmra.mxu1 %v948_v42 }
 0x438   :  { %v1090_v44 = vpop.f32.mrf.mxu0 }
 0x439   :  { %v1091_v45 = vadd.f32 %v1612_v40, %v1090_v44 }
 0x43a   :  { %v1104_v48 = vpop.f32.mrf.mxu1 }
 0x43b   :  { %v1105_v49 = vadd.f32 %v1104_v48, %v1091_v45 }
 0x43d   :  { %v1112_v52 = vmul.f32 2.0, %v1105_v49 }
 0x43f   :  { %v1114_v38 = vsel %vm1111_vm13, %v1112_v52, %v1105_v49 }
 0x440   :  { %v1092_v46 = vpop.f32.mrf.mxu0  ;;  %v1516_v53 = vmul.f32 -1.442695, %v1114_v38 }
 0x441   :  { %v1093_v50 = vadd.f32 %v1612_v40, %v1092_v46 }
 0x442   :  { %1655 = vpow2.f32 %v1516_v53  ;;  %v1106_v51 = vpop.f32.mrf.mxu1 }
 0x443   :  { %v1107_v54 = vadd.f32 %v1106_v51, %v1093_v50 }
 0x445   :  { %v1113_v55 = vmul.f32 2.0, %v1107_v54 }
 0x447   :  { %v1115_v56 = vsel %vm1111_vm13, %v1113_v55, %v1107_v54 }
 0x448   :  { %v1656_v57 = vpop.eup %1655  ;;  %v1517_v58 = vmul.f32 -1.442695, %v1115_v56 }
 0x449   :  { %v1122_v59 = vadd.f32 1.0, %v1656_v57 }
 0x44a   :  { %1657 = vpow2.f32 %v1517_v58 }
 0x44b   :  { %1659 = vrcp.f32 %v1122_v59  ;;  %v1135_v0 = vand.u32 2147483648, %v1122_v59  ;;  %v1133_v3 = vand.u32 2147483647, %v1122_v59  ;;  %vm1129_vm15 = vweird.f32 %v1122_v59 }
 0x44d   :  { %v1136_v10 = vor.u32 1.1754944e-38, %v1135_v0  ;;  %vm1134_vm1 = vcmp.eq.f32.partialorder %v1133_v3, 8.507059e+37 }
 0x450   :  { %v1658_v60 = vpop.eup %1657 }
 0x451   :  { %v1660_v35 = vpop.eup %1659  ;;  %v1123_v61 = vadd.f32 1.0, %v1658_v60 }
 0x452   :  { %v1125_v62 = vmul.f32 %v1660_v35, %v1122_v59  ;;  %vm1130_vm14 = vweird.f32 %v1660_v35 }
 0x453   :  { %1661 = vrcp.f32 %v1123_v61  ;;  %vm1131_vm0 = vmor %vm1129_vm15, %vm1130_vm14  ;;  %v1148_v5 = vand.u32 2147483647, %v1123_v61  ;;  %v1150_v2 = vand.u32 2147483648, %v1123_v61  ;;  %vm1144_vm3 = vweird.f32 %v1123_v61 }
 0x454   :  { %v1126_v63 = vsub.f32 1.0, %v1125_v62 }
 0x455   :  { %v1151_v24 = vor.u32 1.1754944e-38, %v1150_v2  ;;  %vm1149_vm5 = vcmp.eq.f32.partialorder %v1148_v5, 8.507059e+37 }
 0x456   :  { %v1127_v1 = vmul.f32 %v1660_v35, %v1126_v63 }
 0x458   :  { %v1128_v4 = vadd.f32 %v1660_v35, %v1127_v1 }
 0x459   :  { %v1662_v9 = vpop.eup %1661 }
 0x45a   :  { %v1140_v11 = vmul.f32 %v1662_v9, %v1123_v61  ;;  %v1132_v14 = vsel %vm1131_vm0, %v1660_v35, %v1128_v4  ;;  %vm1145_vm2 = vweird.f32 %v1662_v9 }
 0x45b   :  { %v1137_v7 = vsel %vm1134_vm1, %v1136_v10, %v1132_v14  ;;  %vm1146_vm4 = vmor %vm1144_vm3, %vm1145_vm2 }
 0x45c   :  { %v1141_v15 = vsub.f32 1.0, %v1140_v11  ;;  %v1154_v16 = vmul.f32 2.0, %v1137_v7  ;;  %v1158_v17 = vmul.f32 0.9, %v1137_v7 }
 0x45e   :  { %v1142_v6 = vmul.f32 %v1662_v9, %v1141_v15  ;;  %v1518_v18 = vadd.f32 -1.0, %v1154_v16  ;;  %v1160_v19 = vadd.f32 0.1, %v1158_v17 }
 0x460   :  { %v1143_v20 = vadd.f32 %v1662_v9, %v1142_v6  ;;  %v1162_v23 = vsel %vm1111_vm13, %v1518_v18, %v1160_v19 }
 0x461   :  { %1164 = vst [vmem:[#allocation13] sm:$0xff] %v1162_v23 }
 0x462   :  { %v1147_v26 = vsel %vm1146_vm4, %v1662_v9, %v1143_v20 }
 0x463   :  { %v1152_v27 = vsel %vm1149_vm5, %v1151_v24, %v1147_v26 }
 0x464   :  { %v1155_v28 = vmul.f32 2.0, %v1152_v27  ;;  %v1159_v29 = vmul.f32 0.9, %v1152_v27 }
 0x466   :  { %v1519_v30 = vadd.f32 -1.0, %v1155_v28  ;;  %v1161_v8 = vadd.f32 0.1, %v1159_v29 }
 0x468   :  { %v1163_v31 = vsel %vm1111_vm13, %v1519_v30, %v1161_v8 }
 0x469   :  { %1165 = vst [vmem:[#allocation13 + $0x8] sm:$0xff] %v1163_v31 }
 0x46a   :  { %1178 = dma.vmem_to_hbm [thread:$0]  %s1171_s8, 256, %s1173_s13, [#allocation4], %s1842_s9, %s1842_s9, %s1843_s10  }
 0x46b   :  { %1839 = dma.done.wait [#allocation4], 256  }
 0x46c   :  { %1840 = vsyncadd [#allocation4], 4294967040 }
 0x46d   :  { %1183 = vsyncpa [#allocation3], 1 }
 0x46e   :  { %1184 = vsyncpa [#allocation6], 1 }
 0x46f   :  { %1185 = vsyncpa [#allocation9], 1 }
 0x470   :  { %1186 = vsyncpa [#allocation12], 1 }
 0x471   :  { %1187 = vsyncpa [#allocation4], 1 }

</bundles_post_ra>
